<compile_context>
chip_gen: v7x
topology: tpu7x:2x2x1
jax: 0.10.0
libtpu: 0.0.40
codegen_flags: <defaults>
</compile_context>

<pallas_src>
import math

import jax
import jax.numpy as jnp
from jax.experimental import pallas as pl
from jax.experimental.pallas import tpu as pltpu


def _gate_kernel(x_ref, w_ref, b_ref, o_ref):
    # Cast activations to the promoted (output) dtype inside the kernel so the
    # inbound DMA stays narrow and no separate XLA cast pass is needed.
    x = x_ref[...].astype(o_ref.dtype)
    o_ref[...] = x * w_ref[...] + b_ref[...]


# Sublane packing per itemsize: f32 -> 8, bf16/f16 -> 16, int8/fp8 -> 32.
_SUBLANE = {4: 8, 2: 16, 1: 32}
# Max lane-dense folded row width (elements) when C is not 128-aligned.
_MAX_FOLD_WIDTH = 4096


def _vmem_budget():
    """Return (block_budget_bytes, vmem_limit_bytes), generation aware."""
    cap = None
    try:
        cap = getattr(pltpu.get_tpu_info(), "vmem_capacity_bytes", None)
    except Exception:
        cap = None
    if cap is not None and cap >= 100 * 1024 * 1024:
        # v5e / v6e: 128 MiB VMEM per TensorCore -> bigger blocks.
        return 48 * 1024 * 1024, 96 * 1024 * 1024
    # v7x (64 MiB / TC) or unknown: stay conservative.
    return 24 * 1024 * 1024, 40 * 1024 * 1024


def _round_up(x, m):
    return ((x + m - 1) // m) * m


def _pick_fold(n_rows, n_cols):
    """Fold factor `rep`: rows folded per lane-dense row (C not 128-aligned)."""
    base = math.lcm(n_cols, 128) // n_cols
    max_rep = max(base, (_MAX_FOLD_WIDTH // n_cols) // base * base)
    rep = max_rep
    while rep >= base:
        if n_rows % rep == 0:
            return rep
        rep -= base
    # Nothing divides exactly: fold the bulk; caller handles remainder rows.
    return max(base, min(max_rep, (n_rows // base) * base))


def _choose_tiles(n_rows, n_cols, in_itemsize, out_itemsize, budget):
    """Pick (tile_r, tile_c) so double-buffered in+out blocks fit the budget."""
    sub = max(_SUBLANE.get(in_itemsize, 8), _SUBLANE.get(out_itemsize, 8))
    pair = in_itemsize + out_itemsize

    # Channel blocking (the pallas path always sees a 128-aligned last dim).
    # Cap tile_c so at least ~256 rows still fit the budget for very wide C.
    if n_cols % 128 == 0:
        max_c = max(128, (budget // (2 * 256 * pair)) // 128 * 128)
        tile_c = min(n_cols, max_c)
    else:
        tile_c = n_cols  # full-extent block (always layout-legal)

    # Row tile: largest sublane-aligned value whose double-buffered
    # (x block + out block) footprint fits the budget.  No artificial clamp.
    max_r = budget // (2 * tile_c * pair)
    max_r = max(sub, (max_r // sub) * sub)
    tile_r = min(max_r, _round_up(n_rows, sub))

    # Guarantee >= 2 row blocks when possible so both v7x TensorCores get work;
    # on single-core parts this costs one extra grid step (~0.35 us).
    if n_rows >= 2 * sub:
        tile_r = min(tile_r, _round_up((n_rows + 1) // 2, sub))

    if tile_r >= n_rows:
        tile_r = n_rows  # single full-extent block (always layout-legal)
    return tile_r, tile_c


def _gate_pallas(x2d, w_row, b_row, out_dtype, budget, vmem_limit):
    """Run the gate kernel on a 2-D, lane-dense (last dim % 128 == 0) view."""
    R_eff, C_eff = x2d.shape
    in_b = jnp.dtype(x2d.dtype).itemsize
    out_b = jnp.dtype(out_dtype).itemsize
    tile_r, tile_c = _choose_tiles(R_eff, C_eff, in_b, out_b, budget)

    # Channel axis outermost: the (1, tile_c) weight/bias block index stays
    # constant across inner row steps, so they are not re-DMA'd every step.
    grid = (pl.cdiv(C_eff, tile_c), pl.cdiv(R_eff, tile_r))

    return pl.pallas_call(
        _gate_kernel,
        out_shape=jax.ShapeDtypeStruct((R_eff, C_eff), out_dtype),
        grid_spec=pl.GridSpec(
            grid=grid,
            in_specs=[
                pl.BlockSpec((tile_r, tile_c), lambda j, i: (i, j)),
                pl.BlockSpec((1, tile_c), lambda j, i: (0, j)),
                pl.BlockSpec((1, tile_c), lambda j, i: (0, j)),
            ],
            out_specs=pl.BlockSpec((tile_r, tile_c), lambda j, i: (i, j)),
        ),
        compiler_params=pltpu.CompilerParams(
            dimension_semantics=("parallel", "parallel"),
            vmem_limit_bytes=vmem_limit,
        ),
        cost_estimate=pl.CostEstimate(
            flops=2 * R_eff * C_eff,
            bytes_accessed=R_eff * C_eff * (in_b + out_b) + 4 * C_eff * out_b,
            transcendentals=0,
        ),
    )(x2d, w_row.reshape(1, C_eff), b_row.reshape(1, C_eff))


@jax.jit
def gate_forward(x, weight, bias):
    """Apply y = x * weight + bias with a Pallas TPU kernel.

    x: (..., C) float array; weight, bias: (C,).
    """
    orig_shape = x.shape
    C = orig_shape[-1]

    # Match PyTorch type promotion (e.g. bf16 activations with f32 params).
    out_dtype = jnp.result_type(x.dtype, weight.dtype, bias.dtype)

    x2d = x.reshape(-1, C)  # no cast here: promotion happens inside the kernel
    R = x2d.shape[0]
    w = weight.astype(out_dtype)
    b = bias.astype(out_dtype)

    budget, vmem_limit = _vmem_budget()

    if C % 128 == 0:
        out2d = _gate_pallas(x2d, w, b, out_dtype, budget, vmem_limit)
        return out2d.reshape(orig_shape)

    # Lane-dense fold: pack `rep` logical rows into one row of width rep*C
    # (a multiple of 128) so stores are full-lane and DMAs are contiguous.
    rep = _pick_fold(R, C)

    if R % rep == 0:
        w_f = jnp.tile(w, rep)
        b_f = jnp.tile(b, rep)
        out = _gate_pallas(x2d.reshape(R // rep, rep * C), w_f, b_f,
                           out_dtype, budget, vmem_limit)
        return out.reshape(orig_shape)

    R_bulk = (R // rep) * rep
    if R_bulk == 0:
        # Degenerate tiny input (< rep rows): compute directly.
        return (x2d.astype(out_dtype) * w + b).reshape(orig_shape)

    # Rows don't divide the fold factor: keep the bulk lane-dense and handle
    # only the tiny (< rep rows) remainder in plain JAX.
    w_f = jnp.tile(w, rep)
    b_f = jnp.tile(b, rep)
    y_bulk = _gate_pallas(x2d[:R_bulk].reshape(R_bulk // rep, rep * C),
                          w_f, b_f, out_dtype, budget, vmem_limit)
    y_rem = x2d[R_bulk:].astype(out_dtype) * w + b
    out2d = jnp.concatenate([y_bulk.reshape(R_bulk, C), y_rem], axis=0)
    return out2d.reshape(orig_shape)


def init_gate_params(key, C, dtype=jnp.float32):
    """Deterministic synthetic init mirroring Gate.__init__.

    weight: kaiming-uniform-style init with fan_val=1, nonlinearity='linear'
            -> uniform in [-sqrt(3), sqrt(3)].
    bias:   zeros.
    """
    bound = jnp.sqrt(3.0)  # gain('linear') * sqrt(3 / fan_val), fan_val = 1
    weight = jax.random.uniform(key, (C,), dtype=dtype, minval=-bound, maxval=bound)
    bias = jnp.zeros((C,), dtype=dtype)
    return weight, bias


if __name__ == "__main__":
    key = jax.random.PRNGKey(0)
    k_x, k_w, k_x2 = jax.random.split(key, 3)

    # Small shapes consistent with the module: x has shape (..., C)
    B, S, C = 2, 8, 32
    x = jax.random.normal(k_x, (B, S, C), dtype=jnp.float32)
    weight, bias = init_gate_params(k_w, C)

    y = gate_forward(x, weight, bias)
    jax.block_until_ready(y)

    # Correctness check against plain-JAX reference of the PyTorch forward.
    y_ref = x * weight + bias
    assert y.shape == x.shape
    assert jnp.allclose(y, y_ref, atol=1e-6, rtol=1e-6)

    # Remainder path: row count not divisible by the lane-dense fold factor.
    x_odd = jax.random.normal(k_x2, (3, 5, C), dtype=jnp.float32)
    y_odd = gate_forward(x_odd, weight, bias)
    jax.block_until_ready(y_odd)
    assert jnp.allclose(y_odd, x_odd * weight + bias, atol=1e-6, rtol=1e-6)

    # Mixed-dtype path: bf16 activations with f32 params promote to f32
    # inside the kernel (no out-of-kernel cast pass).
    x_bf = x.astype(jnp.bfloat16)
    y_bf = gate_forward(x_bf, weight, bias)
    jax.block_until_ready(y_bf)
    assert y_bf.dtype == jnp.float32
    assert jnp.allclose(y_bf, x_bf.astype(jnp.float32) * weight + bias,
                        atol=1e-2, rtol=1e-2)

    print("KERNEL_OK")
</pallas_src>

<mosaic_0001>
module attributes {stable_mosaic.version = 11 : i64} {
  func.func @_gate_kernel(%arg0: i32, %arg1: i32, %arg2: memref<1x512xf32, #tpu.memory_space<vmem>>, %arg3: memref<1x512xf32, #tpu.memory_space<vmem>>, %arg4: memref<1x512xf32, #tpu.memory_space<vmem>>, %arg5: memref<1x512xf32, #tpu.memory_space<vmem>>) attributes {dimension_semantics = [#tpu.dimension_semantics<parallel>, #tpu.dimension_semantics<parallel>], iteration_bounds = array<i64: 1, 1>, scalar_prefetch = 0 : i64, scratch_operands = 0 : i64, tpu.core_type = #tpu.core_type<tc>, window_params = [{transform_indices = @transform_0, window_bounds = array<i64: 1, 512>}, {transform_indices = @transform_1, window_bounds = array<i64: 1, 512>}, {transform_indices = @transform_2, window_bounds = array<i64: 1, 512>}, {transform_indices = @transform_3, window_bounds = array<i64: 1, 512>}]} {
    %c0 = arith.constant 0 : index
    %c0_0 = arith.constant 0 : index
    %0 = vector.load %arg2[%c0, %c0_0] : memref<1x512xf32, #tpu.memory_space<vmem>>, vector<1x512xf32>
    %c0_1 = arith.constant 0 : index
    %c0_2 = arith.constant 0 : index
    %1 = vector.load %arg3[%c0_1, %c0_2] : memref<1x512xf32, #tpu.memory_space<vmem>>, vector<1x512xf32>
    %2 = arith.mulf %0, %1 : vector<1x512xf32>
    %c0_3 = arith.constant 0 : index
    %c0_4 = arith.constant 0 : index
    %3 = vector.load %arg4[%c0_3, %c0_4] : memref<1x512xf32, #tpu.memory_space<vmem>>, vector<1x512xf32>
    %4 = arith.addf %2, %3 : vector<1x512xf32>
    %c0_5 = arith.constant 0 : index
    %c0_6 = arith.constant 0 : index
    %5 = vector.load %arg5[%c0_5, %c0_6] : memref<1x512xf32, #tpu.memory_space<vmem>>, vector<1x512xf32>
    tpu.vector_store %arg5[%c0_5, %c0_6], %4 {strides = array<i32>} : memref<1x512xf32, #tpu.memory_space<vmem>>, vector<1x512xf32>,
    return
  }
  func.func @transform_0(%arg0: i32, %arg1: i32) -> (i32, i32) {
    %c0_i32 = arith.constant 0 : i32
    return %arg1, %arg0 : i32, i32
  }
  func.func @transform_1(%arg0: i32, %arg1: i32) -> (i32, i32) {
    %c0_i32 = arith.constant 0 : i32
    %c0_i32_0 = arith.constant 0 : i32
    return %c0_i32, %arg0 : i32, i32
  }
  func.func @transform_2(%arg0: i32, %arg1: i32) -> (i32, i32) {
    %c0_i32 = arith.constant 0 : i32
    %c0_i32_0 = arith.constant 0 : i32
    return %c0_i32, %arg0 : i32, i32
  }
  func.func @transform_3(%arg0: i32, %arg1: i32) -> (i32, i32) {
    %c0_i32 = arith.constant 0 : i32
    return %arg1, %arg0 : i32, i32
  }
}

</mosaic_0001>

<bundles_post_ra>
// kernel: tile.13
= control target key start
LH: loop header
LB: loop body
LE: loop exit
PB: predicated region body
PF: predicated region fallthrough
CT: control target
= control target key end

     0   :  { %s28_s0 = inlined_call_operand.vmem [shape: f32[32], index: 0, kind: input, shape index: {}]   ;;  %s29_s1 = inlined_call_operand.vmem [shape: f32[16,32], index: 1, kind: output, shape index: {}]  }
   0x1   :  { %v4_v0 = vld [vmem:[%s28_s0] ss:$0 sm:$0xff] }
   0x2   :  { %5 = vst [vmem:[%s29_s1] sm:$0xff] %v4_v0  ;;  %8 = vst [vmem:[%s29_s1 + $0x8] sm:$0xff] %v4_v0 }

// kernel: tile.18
= control target key start
LH: loop header
LB: loop body
LE: loop exit
PB: predicated region body
PF: predicated region fallthrough
CT: control target
= control target key end

     0   :  { %s57_s8 = smov 96   ;;  %vm3_vm0 = vcmask 261120   ;;  %s59_s15 = smov 64   ;;  %vm9_vm1 = vcmask 1048320   ;;  %vm15_vm2 = vcmask 785920   ;;  %vm21_vm3 = vcmask 523520   ;;  %s94_s0 = inlined_call_operand.vmem [shape: f32[16,32], index: 0, kind: input, shape index: {}]   ;;  %s95_s1 = inlined_call_operand.vmem [shape: f32[1,512], index: 1, kind: output, shape index: {}]  }
   0x1   :  { %v48_v0 = vld [vmem:[%s94_s0 + $0x3] ss:$4 sm:$0xf]   ;;  %v49_v1 = vld [vmem:[%s94_s0 + $0x2] ss:$4 sm:$0xf]  }
   0x2   :  { %7 = vrot.lane.b32.xlu0 %v48_v0, %s57_s8  ;;  %v50_v2 = vld [vmem:[%s94_s0 + $0x1] ss:$4 sm:$0xf]   ;;  %v2_v3 = vld [vmem:[%s94_s0] ss:$4 sm:$0xf]  }
   0x3   :  { %s58_s0 = smov 32   ;;  %4 = vst.msk [vmem:[#allocation0] ss:$8 sm:$0xf] %vm3_vm0, %v2_v3  }
   0x4   :  { %19 = vrot.lane.b32.xlu1 %v50_v2, %s58_s0 }
   0x6   :  { %13 = vrot.lane.b32.xlu0 %v49_v1, %s59_s15 }
  0x74   :  { %v8_v4 = vpop.permute.xlu0 %7  }
  0x75   :  { %10 = vst.msk [vmem:[#allocation0] ss:$8 sm:$0xf] %vm9_vm1, %v8_v4  }
  0x76   :  { %v20_v5 = vpop.permute.xlu1 %19  }
  0x78   :  { %v14_v6 = vpop.permute.xlu0 %13  }
  0x79   :  { %16 = vst.msk [vmem:[#allocation0] ss:$8 sm:$0xf] %vm15_vm2, %v14_v6  }
  0x7a   :  { %22 = vst.msk [vmem:[#allocation0] ss:$8 sm:$0xf] %vm21_vm3, %v20_v5  }
  0x81   :  { %v26_v7 = vld [vmem:[#allocation0] sm:$0x1]  ;;  %v30_v8 = vld [vmem:[#allocation0 + $0x8] sm:$0x1]  ;;  %v35_v9 = vld [vmem:[#allocation0 + $0x10] sm:$0x1] }
  0x82   :  { %28 = vst [vmem:[%s95_s1] sm:$0x1] %v26_v7  ;;  %51 = vst [vmem:[%s95_s1 + $0x1] sm:$0x1] %v30_v8  ;;  %v41_v10 = vld [vmem:[#allocation0 + $0x18] sm:$0x1] }
  0x83   :  { %52 = vst [vmem:[%s95_s1 + $0x2] sm:$0x1] %v35_v9  ;;  %53 = vst [vmem:[%s95_s1 + $0x3] sm:$0x1] %v41_v10 }

// kernel: gate_forward.1
= control target key start
LH: loop header
LB: loop body
LE: loop exit
PB: predicated region body
PF: predicated region fallthrough
CT: control target
= control target key end

     0   :  { %v19_v0 = vlaneseq  ;;  %s60_s0 = inlined_call_operand.vmem [shape: f32[1,512], index: 0, kind: input, shape index: {}]   ;;  %s61_s1 = inlined_call_operand.vmem [shape: f32[1,512], index: 1, kind: input, shape index: {}]   ;;  %s62_s2 = inlined_call_operand.vmem [shape: f32[1,512], index: 2, kind: input, shape index: {}]   ;;  %s63_s3 = inlined_call_operand.vmem [shape: f32[1,512], index: 3, kind: output, shape index: {}]  }
   0x1   :  { %v14_v1 = vld [vmem:[%s60_s0] sm:$0xf] }
   0x2   :  { %v15_v2 = vld [vmem:[%s61_s1] sm:$0xf]  ;;  %vm21_vm0 = vcmp.lt.s32.totalorder %v19_v0, 512 }
   0x3   :  { %v17_v3 = vld [vmem:[%s62_s2] sm:$0xf]  ;;  %v16_v4 = vmul.f32 %v15_v2, %v14_v1 }
   0x5   :  { %v18_v5 = vadd.f32 %v17_v3, %v16_v4 }
   0x7   :  { %23 = vst.msk [vmem:[%s63_s3] sm:$0xf] %vm21_vm0, %v18_v5 }

</bundles_post_ra>
